<compile_context>
chip_gen: v7x
topology: tpu7x:2x2x1
jax: 0.10.0
libtpu: 0.0.40
codegen_flags: <defaults>
</compile_context>

<pallas_src>
import functools

import jax
import jax.numpy as jnp
from jax import lax
from jax.experimental import pallas as pl
from jax.experimental.pallas import tpu as pltpu


def _layernorm_pre_kernel(x_ref, o_ref, *, eps, d_model):
    # x_ref block: (TR, D); normalize each row over the last axis.
    x = x_ref[...].astype(jnp.float32)
    inv_d = jnp.float32(1.0 / d_model)
    mean = jnp.sum(x, axis=-1, keepdims=True) * inv_d
    c = x - mean
    var = jnp.sum(c * c, axis=-1, keepdims=True) * inv_d   # centered: var >= 0
    inv_scale = lax.rsqrt(var + jnp.float32(eps))           # EUP rsqrt
    o_ref[...] = (c * inv_scale).astype(o_ref.dtype)


def layernorm_pre(x, eps=1e-5, block_rows=None):
    """x: (..., d_model) -> same shape/dtype, normalized over the last axis."""
    orig_shape = x.shape
    D = orig_shape[-1]
    x2 = x.reshape(-1, D)                     # free reshape over leading dims
    total = x2.shape[0]

    if block_rows is None:
        block_rows = 1024

    # Realistic per-row VMEM footprint:
    #   2x double-buffered input + 2x double-buffered output (I/O dtype)
    #   + ~3 f32 working copies inside the kernel (x32, centered, squared).
    io_bytes_per_row = 2 * D * x.dtype.itemsize * 2
    temp_bytes_per_row = 3 * D * 4
    per_row = io_bytes_per_row + temp_bytes_per_row
    budget = 32 * 1024 * 1024                 # total footprint target (all chips)
    cap_rows = max(8, (budget // per_row) // 8 * 8)

    tr = min(block_rows, cap_rows)

    # Keep the grid fed: aim for >= 8 steps when there is enough work so the
    # double-buffered pipeline hides DMA and both v7x TensorCores get tiles.
    min_steps = 8
    if total >= min_steps * 8:
        tr = min(tr, max(8, (total // min_steps) // 8 * 8))

    if tr >= total:
        tr = total                            # full-extent block: always legal
    else:
        tr = max(8, (tr // 8) * 8)            # sublane-aligned row tile

    grid_steps = pl.cdiv(total, tr)           # ragged last block is masked

    kernel = functools.partial(_layernorm_pre_kernel, eps=float(eps), d_model=D)
    out = pl.pallas_call(
        kernel,
        out_shape=jax.ShapeDtypeStruct((total, D), x.dtype),
        grid_spec=pltpu.PrefetchScalarGridSpec(
            num_scalar_prefetch=0,
            grid=(grid_steps,),
            in_specs=[pl.BlockSpec((tr, D), lambda i: (i, 0))],
            out_specs=pl.BlockSpec((tr, D), lambda i: (i, 0)),
        ),
        compiler_params=pltpu.CompilerParams(
            dimension_semantics=("parallel",),
            vmem_limit_bytes=48 * 1024 * 1024,   # explicit, safe on v5e/v6e/v7x
        ),
    )(x2)

    return out.reshape(orig_shape)


def layernorm_pre_ref(x, eps=1e-5):
    x32 = x.astype(jnp.float32)
    c = x32 - jnp.mean(x32, axis=-1, keepdims=True)
    scale = jnp.sqrt(jnp.mean(c * c, axis=-1, keepdims=True) + eps)
    return (c / scale).astype(x.dtype)


if __name__ == "__main__":
    key = jax.random.PRNGKey(0)

    # Small shape matching the module's 'batch pos embed' layout.
    batch, pos, d_model = 2, 8, 128
    x = jax.random.normal(key, (batch, pos, d_model), dtype=jnp.float32)

    out = layernorm_pre(x, eps=1e-5)
    out = jax.block_until_ready(out)
    ref = layernorm_pre_ref(x, eps=1e-5)
    assert out.shape == x.shape and out.dtype == x.dtype
    assert jnp.allclose(out, ref, atol=1e-4, rtol=1e-4)

    # Second case exercising multi-step grid + masked ragged last block
    # (111 rows, tile of 8 -> 14 grid steps, last block ragged).
    key2 = jax.random.PRNGKey(0)
    x2 = jax.random.normal(key2, (3, 37, 128), dtype=jnp.float32)
    out2 = jax.block_until_ready(layernorm_pre(x2, eps=1e-5, block_rows=16))
    ref2 = layernorm_pre_ref(x2, eps=1e-5)
    assert out2.shape == x2.shape and out2.dtype == x2.dtype
    assert jnp.allclose(out2, ref2, atol=1e-4, rtol=1e-4)

    print("KERNEL_OK")
</pallas_src>

<mosaic_0001>
module attributes {stable_mosaic.version = 11 : i64} {
  func.func @_layernorm_pre_kernel(%arg0: i32, %arg1: memref<16x128xf32, #tpu.memory_space<vmem>>, %arg2: memref<16x128xf32, #tpu.memory_space<vmem>>) attributes {dimension_semantics = [#tpu.dimension_semantics<parallel>], iteration_bounds = array<i64: 1>, scalar_prefetch = 0 : i64, scratch_operands = 0 : i64, tpu.core_type = #tpu.core_type<tc>, window_params = [{transform_indices = @transform_0, window_bounds = array<i64: 16, 128>}, {transform_indices = @transform_1, window_bounds = array<i64: 16, 128>}]} {
    %c0 = arith.constant 0 : index
    %c0_0 = arith.constant 0 : index
    %0 = vector.load %arg1[%c0, %c0_0] : memref<16x128xf32, #tpu.memory_space<vmem>>, vector<16x128xf32>
    %cst = arith.constant dense<0.000000e+00> : vector<16xf32>
    %1 = vector.multi_reduction <add>, %0, %cst [1] : vector<16x128xf32> to vector<16xf32>
    %2 = vector.shape_cast %1 : vector<16xf32> to vector<16x1xf32>
    %cst_1 = arith.constant 7.812500e-03 : f32
    %3 = vector.broadcast %cst_1 : f32 to vector<16x1xf32>
    %4 = arith.mulf %2, %3 : vector<16x1xf32>
    %5 = vector.broadcast %4 : vector<16x1xf32> to vector<16x128xf32>
    %6 = arith.subf %0, %5 : vector<16x128xf32>
    %7 = arith.mulf %6, %6 : vector<16x128xf32>
    %cst_2 = arith.constant dense<0.000000e+00> : vector<16xf32>
    %8 = vector.multi_reduction <add>, %7, %cst_2 [1] : vector<16x128xf32> to vector<16xf32>
    %9 = vector.shape_cast %8 : vector<16xf32> to vector<16x1xf32>
    %cst_3 = arith.constant 7.812500e-03 : f32
    %10 = vector.broadcast %cst_3 : f32 to vector<16x1xf32>
    %11 = arith.mulf %9, %10 : vector<16x1xf32>
    %cst_4 = arith.constant 9.99999974E-6 : f32
    %12 = vector.broadcast %cst_4 : f32 to vector<16x1xf32>
    %13 = arith.addf %11, %12 : vector<16x1xf32>
    %14 = math.rsqrt %13 : vector<16x1xf32>
    %15 = vector.broadcast %14 : vector<16x1xf32> to vector<16x128xf32>
    %16 = arith.mulf %6, %15 : vector<16x128xf32>
    %c0_5 = arith.constant 0 : index
    %c0_6 = arith.constant 0 : index
    %17 = vector.load %arg2[%c0_5, %c0_6] : memref<16x128xf32, #tpu.memory_space<vmem>>, vector<16x128xf32>
    tpu.vector_store %arg2[%c0_5, %c0_6], %16 {strides = array<i32>} : memref<16x128xf32, #tpu.memory_space<vmem>>, vector<16x128xf32>,
    return
  }
  func.func @transform_0(%arg0: i32) -> (i32, i32) {
    %c0_i32 = arith.constant 0 : i32
    %c0_i32_0 = arith.constant 0 : i32
    return %arg0, %c0_i32 : i32, i32
  }
  func.func @transform_1(%arg0: i32) -> (i32, i32) {
    %c0_i32 = arith.constant 0 : i32
    %c0_i32_0 = arith.constant 0 : i32
    return %arg0, %c0_i32 : i32, i32
  }
}

</mosaic_0001>

<bundles_post_ra>
// kernel: tpu_custom_call.1
= control target key start
LH: loop header
LB: loop body
LE: loop exit
PB: predicated region body
PF: predicated region fallthrough
CT: control target
= control target key end

     0   :  { %6 = vsyncpa [#allocation3], 0  ;;  %s166_s0 = inlined_call_operand.hbm [shape: f32[16,128], index: 0, kind: input, shape index: {}]   ;;  %s167_s1 = inlined_call_operand.hbm [shape: f32[16,128], index: 1, kind: output, shape index: {}]  }
   0x1   :  { %7 = vsyncpa [#allocation4], 0  ;;  %s122_s6 = smov [#allocation2]   ;;  %s74_s10 = scalar_lea.hbm %s166_s0, 256 }
   0x2   :  { %s13_s7 = sshll.u32 %s122_s6, 4  ;;  %p75_p0 = scmp.ne.s32.totalorder %s166_s0, %s74_s10  ;;  %s14_s7 = int_to_ptr.vmem [resolvable:$true] %s13_s7 }
   0x3   :  { %p78_p1 = scmp.lt.u32.totalorder %s74_s10, %s166_s0 }
   0x5   :  { %p80_p2 = pnand %p78_p1, %p75_p0 }
   0x7   :  { %83 = shalt.err (!%p80_p2)
}
   0x8   :  { %s84_s15 = scalar_lea.vmem %s14_s7, 256  ;;  %p89_p4 = scmp.lt.s32.totalorder %s14_s7, %s14_s7 }
   0x9   :  { %p85_p3 = scmp.ne.s32.totalorder %s14_s7, %s84_s15  ;;  %p90_p5 = scmp.lt.s32.totalorder %s84_s15, %s84_s15 }
   0xb   :  { %p91_p6 = por %p90_p5, %p89_p4 }
   0xd   :  { %p92_p7 = pnand %p91_p6, %p85_p3 }
   0xf   :  { %95 = shalt.err (!%p92_p7)
}
  0x10   :  { %s123_s16 = smov 128   ;;  %s124_s17 = smov 8  }
  0x11   :  { %19 = dma.hbm_to_vmem [thread:$0]  %s166_s0, 256, %s14_s7, [#allocation3], %s123_s16, %s123_s16, %s124_s17  }
  0x12   :  { %118 = dma.done.wait [#allocation3], 256  }
  0x13   :  { %119 = vsyncadd [#allocation3], 4294967040  ;;  %v23_v0 = vld [vmem:[#allocation2] sm:$0xff]  ;;  %v24_v1 = vld [vmem:[#allocation2 + $0x8] sm:$0xff]  ;;  %s125_s0 = smov [#allocation5]  }
  0x14   :  { %25 = vadd.xlane.f32.xlu0 %v23_v0  ;;  %s54_s20 = sshll.u32 %s125_s0, 4  ;;  %s55_s20 = int_to_ptr.vmem [resolvable:$true] %s54_s20 }
  0x15   :  { %s96_s21 = scalar_lea.vmem %s55_s20, 256  ;;  %p101_p9 = scmp.lt.s32.totalorder %s55_s20, %s55_s20 }
  0x16   :  { %p97_p8 = scmp.ne.s32.totalorder %s55_s20, %s96_s21  ;;  %p102_p10 = scmp.lt.s32.totalorder %s96_s21, %s96_s21 }
  0x18   :  { %27 = vadd.xlane.f32.xlu0 %v24_v1  ;;  %p103_p11 = por %p102_p10, %p101_p9 }
  0x1a   :  { %p104_p12 = pnand %p103_p11, %p97_p8 }
  0xa1   :  { %v26_v2 = vpop.xlane.xlu0 %25 }
  0xa2   :  { %v29_v3 = vmul.f32 0.0078125, %v26_v2 }
  0xa4   :  { %v31_v4 = vsub.f32 %v23_v0, %v29_v3 }
  0xa5   :  { %v28_v5 = vpop.xlane.xlu0 %27 }
  0xa6   :  { %v30_v6 = vmul.f32 0.0078125, %v28_v5  ;;  %v33_v7 = vmul.f32 %v31_v4, %v31_v4 }
  0xa8   :  { %v32_v8 = vsub.f32 %v24_v1, %v30_v6  ;;  %35 = vadd.xlane.f32.xlu1 %v33_v7 }
  0xaa   :  { %v34_v9 = vmul.f32 %v32_v8, %v32_v8 }
  0xac   :  { %37 = vadd.xlane.f32.xlu1 %v34_v9 }
 0x135   :  { %v36_v10 = vpop.xlane.xlu1 %35 }
 0x136   :  { %v39_v11 = vmul.f32 0.0078125, %v36_v10 }
 0x138   :  { %v41_v12 = vadd.f32 1e-05, %v39_v11 }
 0x139   :  { %v38_v13 = vpop.xlane.xlu1 %37 }
 0x13a   :  { %70 = vrsqrt.f32 %v41_v12  ;;  %v40_v14 = vmul.f32 0.0078125, %v38_v13 }
 0x13c   :  { %v42_v15 = vadd.f32 1e-05, %v40_v14 }
 0x13e   :  { %72 = vrsqrt.f32 %v42_v15 }
 0x144   :  { %v71_v16 = vpop.eup %70 }
 0x145   :  { %v45_v17 = vmul.f32 %v71_v16, %v31_v4 }
 0x147   :  { %47 = vst [vmem:[#allocation5] sm:$0xff] %v45_v17 }
 0x148   :  { %v73_v18 = vpop.eup %72 }
 0x149   :  { %v46_v19 = vmul.f32 %v73_v18, %v32_v8 }
 0x14b   :  { %48 = vst [vmem:[#allocation5 + $0x8] sm:$0xff] %v46_v19 }
 0x14c   :  { %107 = shalt.err (!%p104_p12)
}
 0x14d   :  { %s108_s24 = scalar_lea.hbm %s167_s1, 256 }
 0x14e   :  { %p109_p13 = scmp.ne.s32.totalorder %s167_s1, %s108_s24  ;;  %p112_p0 = scmp.lt.u32.totalorder %s108_s24, %s167_s1 }
 0x150   :  { %p114_p1 = pnand %p112_p0, %p109_p13 }
 0x152   :  { %117 = shalt.err (!%p114_p1)
}
 0x153   :  { %60 = dma.vmem_to_hbm [thread:$0]  %s55_s20, 256, %s167_s1, [#allocation4], %s123_s16, %s123_s16, %s124_s17  }
 0x154   :  { %120 = dma.done.wait [#allocation4], 256  }
 0x155   :  { %121 = vsyncadd [#allocation4], 4294967040 }
 0x156   :  { %64 = vsyncpa [#allocation3], 1 }
 0x157   :  { %65 = vsyncpa [#allocation4], 1 }

</bundles_post_ra>
